<compile_context>
chip_gen: v7x
topology: tpu7x:2x2x1
jax: 0.10.0
libtpu: 0.0.40
codegen_flags: <defaults>
</compile_context>

<pallas_src>
import functools

import jax
import jax.numpy as jnp
from jax.experimental import pallas as pl
from jax.experimental.pallas import tpu as pltpu

LOG_STD_MAX = 2.0
LOG_STD_MIN = -5.0


def _round_up(x, m):
    return (x + m - 1) // m * m


def gaussian_policy_mean_kernel(obs_ref, w1_ref, b1_ref, w2_ref, b2_ref,
                                w3_ref, b3_ref, mean_ref):
    """One batch tile of the policy MLP: Linear -> ReLU -> Linear -> ReLU -> Linear."""
    cdt = w1_ref.dtype  # MXU operand dtype (e.g. bfloat16)

    # In-VMEM cast of the f32 obs tile (VPU, co-issues; obs stays f32 in HBM).
    x = obs_ref[...].astype(cdt)

    h1 = jnp.dot(x, w1_ref[...], preferred_element_type=jnp.float32)
    h1 = jnp.maximum(h1 + b1_ref[...], 0.0)

    h2 = jnp.dot(h1.astype(cdt), w2_ref[...], preferred_element_type=jnp.float32)
    h2 = jnp.maximum(h2 + b2_ref[...], 0.0)

    mean = jnp.dot(h2.astype(cdt), w3_ref[...], preferred_element_type=jnp.float32)
    mean_ref[...] = (mean + b3_ref[...]).astype(mean_ref.dtype)


def gaussian_policy_forward(obs, params, *, block_b=1024,
                            compute_dtype=jnp.bfloat16):
    """Returns (mean, scale_tril) — the parameters of the MultivariateNormal."""
    B, state_dim = obs.shape
    hidden = params["w1"].shape[1]
    act_dim = params["w3"].shape[1]

    # --- batch tile: multiple of 8 (f32 sublanes); keep >= 2 grid steps when
    # possible so "parallel" can shard across both v7x TensorCores. ---
    tb = min(block_b, max(8, _round_up(pl.cdiv(B, 2), 8)))
    grid = (pl.cdiv(B, tb),)  # ragged last block: OOB writes are masked by Pallas

    # MXU operands in bf16 (weights are tiny); biases stay f32 for the epilogue.
    w1 = params["w1"].astype(compute_dtype)
    w2 = params["w2"].astype(compute_dtype)
    w3 = params["w3"].astype(compute_dtype)
    b1 = params["b1"].reshape(1, -1).astype(jnp.float32)
    b2 = params["b2"].reshape(1, -1).astype(jnp.float32)
    b3 = params["b3"].reshape(1, -1).astype(jnp.float32)

    def resident(shape):
        # Constant block index -> stays resident in VMEM across grid steps.
        return pl.BlockSpec(shape, lambda i: tuple(0 for _ in shape))

    in_arrays = (obs, w1, b1, w2, b2, w3, b3)
    in_specs = [
        pl.BlockSpec((tb, state_dim), lambda i: (i, 0)),
        resident(w1.shape), resident(b1.shape),
        resident(w2.shape), resident(b2.shape),
        resident(w3.shape), resident(b3.shape),
    ]
    out_shape = jax.ShapeDtypeStruct((B, act_dim), jnp.float32)
    out_spec = pl.BlockSpec((tb, act_dim), lambda i: (i, 0))

    flops = 2 * B * (state_dim * hidden + hidden * hidden + hidden * act_dim)
    bytes_accessed = (sum(int(a.size) * a.dtype.itemsize for a in in_arrays)
                      + B * act_dim * 4)
    cost = pl.CostEstimate(flops=flops, transcendentals=0,
                           bytes_accessed=bytes_accessed)

    mean = pl.pallas_call(
        gaussian_policy_mean_kernel,
        out_shape=out_shape,
        grid=grid,
        in_specs=in_specs,
        out_specs=out_spec,
        compiler_params=pltpu.CompilerParams(
            dimension_semantics=("parallel",),   # megacore sharding on v7x
        ),
        cost_estimate=cost,
    )(*in_arrays)

    # scale_tril depends only on log_std (not on obs) -> hoisted into plain JAX.
    std = jnp.exp(jnp.clip(params["log_std"], LOG_STD_MIN, LOG_STD_MAX))
    scale_tril = jnp.diag(std)
    return mean, scale_tril


def init_params(key, state_dim, act_dim, hidden_dim):
    """Deterministic init mimicking PyTorch nn.Linear default (U[-1/sqrt(fan_in), +])."""
    def linear(k, fan_in, fan_out):
        kw, kb = jax.random.split(k)
        bound = 1.0 / jnp.sqrt(fan_in)
        w = jax.random.uniform(kw, (fan_in, fan_out), jnp.float32, -bound, bound)
        b = jax.random.uniform(kb, (fan_out,), jnp.float32, -bound, bound)
        return w, b

    k1, k2, k3 = jax.random.split(key, 3)
    w1, b1 = linear(k1, state_dim, hidden_dim)
    w2, b2 = linear(k2, hidden_dim, hidden_dim)
    w3, b3 = linear(k3, hidden_dim, act_dim)
    log_std = jnp.zeros((act_dim,), jnp.float32)  # nn.Parameter(torch.zeros(act_dim))
    return {"w1": w1, "b1": b1, "w2": w2, "b2": b2, "w3": w3, "b3": b3,
            "log_std": log_std}


def reference_forward_f32(obs, params):
    """Pure f32 reference matching the PyTorch module semantics."""
    h1 = jnp.maximum(obs @ params["w1"] + params["b1"], 0.0)
    h2 = jnp.maximum(h1 @ params["w2"] + params["b2"], 0.0)
    mean = h2 @ params["w3"] + params["b3"]
    std = jnp.exp(jnp.clip(params["log_std"], LOG_STD_MIN, LOG_STD_MAX))
    return mean, jnp.diag(std)


def reference_forward_bf16(obs, params, compute_dtype=jnp.bfloat16):
    """Reference using the same bf16-operand / f32-accumulate recipe as the kernel."""
    cdt = compute_dtype
    w1 = params["w1"].astype(cdt)
    w2 = params["w2"].astype(cdt)
    w3 = params["w3"].astype(cdt)
    h1 = jnp.maximum(
        jnp.dot(obs.astype(cdt), w1, preferred_element_type=jnp.float32)
        + params["b1"], 0.0)
    h2 = jnp.maximum(
        jnp.dot(h1.astype(cdt), w2, preferred_element_type=jnp.float32)
        + params["b2"], 0.0)
    mean = jnp.dot(h2.astype(cdt), w3, preferred_element_type=jnp.float32) + params["b3"]
    std = jnp.exp(jnp.clip(params["log_std"], LOG_STD_MIN, LOG_STD_MAX))
    return mean, jnp.diag(std)


if __name__ == "__main__":
    # Small shapes consistent with the module: batch=8, state_dim=16,
    # hidden_dim=32 (n_hidden=2), act_dim=8.
    B, STATE_DIM, ACT_DIM, HIDDEN = 8, 16, 8, 32

    key = jax.random.PRNGKey(0)
    k_obs, k_params = jax.random.split(key)

    obs = jax.random.normal(k_obs, (B, STATE_DIM), jnp.float32)
    params = init_params(k_params, STATE_DIM, ACT_DIM, HIDDEN)

    # jit the whole wrapper so weight casts / reshapes are not separate dispatches.
    fwd = jax.jit(functools.partial(gaussian_policy_forward, block_b=1024))
    mean, scale_tril = fwd(obs, params)
    jax.block_until_ready((mean, scale_tril))

    assert mean.shape == (B, ACT_DIM)
    assert scale_tril.shape == (ACT_DIM, ACT_DIM)

    # Tight check against a reference using the identical bf16/f32 recipe.
    mean_bf, tril_bf = reference_forward_bf16(obs, params)
    assert jnp.allclose(mean, mean_bf, atol=1e-4, rtol=1e-4)
    assert jnp.allclose(scale_tril, tril_bf, atol=1e-6, rtol=1e-6)

    # Loose sanity check against the pure-f32 PyTorch-equivalent reference
    # (tolerance relaxed because the kernel uses bf16 MXU operands).
    mean_f32, tril_f32 = reference_forward_f32(obs, params)
    assert jnp.allclose(mean, mean_f32, atol=5e-2, rtol=5e-2)
    assert jnp.allclose(scale_tril, tril_f32, atol=1e-6, rtol=1e-6)

    print("KERNEL_OK")
</pallas_src>

<mosaic_0001>
module attributes {stable_mosaic.version = 11 : i64} {
  func.func @gaussian_policy_mean_kernel(%arg0: i32, %arg1: memref<8x16xf32, #tpu.memory_space<vmem>>, %arg2: memref<16x32xbf16, #tpu.memory_space<vmem>>, %arg3: memref<1x32xf32, #tpu.memory_space<vmem>>, %arg4: memref<32x32xbf16, #tpu.memory_space<vmem>>, %arg5: memref<1x32xf32, #tpu.memory_space<vmem>>, %arg6: memref<32x8xbf16, #tpu.memory_space<vmem>>, %arg7: memref<1x8xf32, #tpu.memory_space<vmem>>, %arg8: memref<8x8xf32, #tpu.memory_space<vmem>>) attributes {dimension_semantics = [#tpu.dimension_semantics<parallel>], iteration_bounds = array<i64: 1>, scalar_prefetch = 0 : i64, scratch_operands = 0 : i64, tpu.core_type = #tpu.core_type<tc>, window_params = [{transform_indices = @transform_0, window_bounds = array<i64: 8, 16>}, {pipeline_mode = #tpu.pipeline_mode<synchronous>, transform_indices = @transform_1, window_bounds = array<i64: 16, 32>}, {pipeline_mode = #tpu.pipeline_mode<synchronous>, transform_indices = @transform_2, window_bounds = array<i64: 1, 32>}, {pipeline_mode = #tpu.pipeline_mode<synchronous>, transform_indices = @transform_3, window_bounds = array<i64: 32, 32>}, {pipeline_mode = #tpu.pipeline_mode<synchronous>, transform_indices = @transform_4, window_bounds = array<i64: 1, 32>}, {pipeline_mode = #tpu.pipeline_mode<synchronous>, transform_indices = @transform_5, window_bounds = array<i64: 32, 8>}, {pipeline_mode = #tpu.pipeline_mode<synchronous>, transform_indices = @transform_6, window_bounds = array<i64: 1, 8>}, {transform_indices = @transform_7, window_bounds = array<i64: 8, 8>}]} {
    %c0 = arith.constant 0 : index
    %c0_0 = arith.constant 0 : index
    %0 = vector.load %arg1[%c0, %c0_0] : memref<8x16xf32, #tpu.memory_space<vmem>>, vector<8x16xf32>
    %1 = arith.truncf %0 : vector<8x16xf32> to vector<8x16xbf16>
    %c0_1 = arith.constant 0 : index
    %c0_2 = arith.constant 0 : index
    %2 = vector.load %arg2[%c0_1, %c0_2] : memref<16x32xbf16, #tpu.memory_space<vmem>>, vector<16x32xbf16>
    %cst = arith.constant dense<0.000000e+00> : vector<8x32xf32>
    %3 = tpu.matmul %1, %2, %cst {dimension_numbers = #tpu.dot_dimension_numbers<[1], [0], [0], [1], [0, 0, 1, 1], [], []>} : vector<8x16xbf16>, vector<16x32xbf16>, vector<8x32xf32> -> vector<8x32xf32>
    %c0_3 = arith.constant 0 : index
    %c0_4 = arith.constant 0 : index
    %4 = vector.load %arg3[%c0_3, %c0_4] : memref<1x32xf32, #tpu.memory_space<vmem>>, vector<1x32xf32>
    %5 = vector.broadcast %4 : vector<1x32xf32> to vector<8x32xf32>
    %6 = arith.addf %3, %5 : vector<8x32xf32>
    %cst_5 = arith.constant 0.000000e+00 : f32
    %7 = vector.broadcast %cst_5 : f32 to vector<8x32xf32>
    %8 = arith.maximumf %6, %7 : vector<8x32xf32>
    %9 = arith.truncf %8 : vector<8x32xf32> to vector<8x32xbf16>
    %c0_6 = arith.constant 0 : index
    %c0_7 = arith.constant 0 : index
    %10 = vector.load %arg4[%c0_6, %c0_7] : memref<32x32xbf16, #tpu.memory_space<vmem>>, vector<32x32xbf16>
    %cst_8 = arith.constant dense<0.000000e+00> : vector<8x32xf32>
    %11 = tpu.matmul %9, %10, %cst_8 {dimension_numbers = #tpu.dot_dimension_numbers<[1], [0], [0], [1], [0, 0, 1, 1], [], []>} : vector<8x32xbf16>, vector<32x32xbf16>, vector<8x32xf32> -> vector<8x32xf32>
    %c0_9 = arith.constant 0 : index
    %c0_10 = arith.constant 0 : index
    %12 = vector.load %arg5[%c0_9, %c0_10] : memref<1x32xf32, #tpu.memory_space<vmem>>, vector<1x32xf32>
    %13 = vector.broadcast %12 : vector<1x32xf32> to vector<8x32xf32>
    %14 = arith.addf %11, %13 : vector<8x32xf32>
    %cst_11 = arith.constant 0.000000e+00 : f32
    %15 = vector.broadcast %cst_11 : f32 to vector<8x32xf32>
    %16 = arith.maximumf %14, %15 : vector<8x32xf32>
    %17 = arith.truncf %16 : vector<8x32xf32> to vector<8x32xbf16>
    %c0_12 = arith.constant 0 : index
    %c0_13 = arith.constant 0 : index
    %18 = vector.load %arg6[%c0_12, %c0_13] : memref<32x8xbf16, #tpu.memory_space<vmem>>, vector<32x8xbf16>
    %cst_14 = arith.constant dense<0.000000e+00> : vector<8x8xf32>
    %19 = tpu.matmul %17, %18, %cst_14 {dimension_numbers = #tpu.dot_dimension_numbers<[1], [0], [0], [1], [0, 0, 1, 1], [], []>} : vector<8x32xbf16>, vector<32x8xbf16>, vector<8x8xf32> -> vector<8x8xf32>
    %c0_15 = arith.constant 0 : index
    %c0_16 = arith.constant 0 : index
    %20 = vector.load %arg7[%c0_15, %c0_16] : memref<1x8xf32, #tpu.memory_space<vmem>>, vector<1x8xf32>
    %21 = vector.broadcast %20 : vector<1x8xf32> to vector<8x8xf32>
    %22 = arith.addf %19, %21 : vector<8x8xf32>
    %c0_17 = arith.constant 0 : index
    %c0_18 = arith.constant 0 : index
    %23 = vector.load %arg8[%c0_17, %c0_18] : memref<8x8xf32, #tpu.memory_space<vmem>>, vector<8x8xf32>
    tpu.vector_store %arg8[%c0_17, %c0_18], %22 {strides = array<i32>} : memref<8x8xf32, #tpu.memory_space<vmem>>, vector<8x8xf32>,
    return
  }
  func.func @transform_0(%arg0: i32) -> (i32, i32) {
    %c0_i32 = arith.constant 0 : i32
    %c0_i32_0 = arith.constant 0 : i32
    return %arg0, %c0_i32 : i32, i32
  }
  func.func @transform_1(%arg0: i32) -> (i32, i32) {
    %c0_i32 = arith.constant 0 : i32
    %c0_i32_0 = arith.constant 0 : i32
    %c0_i32_1 = arith.constant 0 : i32
    return %c0_i32, %c0_i32_0 : i32, i32
  }
  func.func @transform_2(%arg0: i32) -> (i32, i32) {
    %c0_i32 = arith.constant 0 : i32
    %c0_i32_0 = arith.constant 0 : i32
    %c0_i32_1 = arith.constant 0 : i32
    return %c0_i32, %c0_i32_0 : i32, i32
  }
  func.func @transform_3(%arg0: i32) -> (i32, i32) {
    %c0_i32 = arith.constant 0 : i32
    %c0_i32_0 = arith.constant 0 : i32
    %c0_i32_1 = arith.constant 0 : i32
    return %c0_i32, %c0_i32_0 : i32, i32
  }
  func.func @transform_4(%arg0: i32) -> (i32, i32) {
    %c0_i32 = arith.constant 0 : i32
    %c0_i32_0 = arith.constant 0 : i32
    %c0_i32_1 = arith.constant 0 : i32
    return %c0_i32, %c0_i32_0 : i32, i32
  }
  func.func @transform_5(%arg0: i32) -> (i32, i32) {
    %c0_i32 = arith.constant 0 : i32
    %c0_i32_0 = arith.constant 0 : i32
    %c0_i32_1 = arith.constant 0 : i32
    return %c0_i32, %c0_i32_0 : i32, i32
  }
  func.func @transform_6(%arg0: i32) -> (i32, i32) {
    %c0_i32 = arith.constant 0 : i32
    %c0_i32_0 = arith.constant 0 : i32
    %c0_i32_1 = arith.constant 0 : i32
    return %c0_i32, %c0_i32_0 : i32, i32
  }
  func.func @transform_7(%arg0: i32) -> (i32, i32) {
    %c0_i32 = arith.constant 0 : i32
    %c0_i32_0 = arith.constant 0 : i32
    return %arg0, %c0_i32 : i32, i32
  }
}

</mosaic_0001>

<bundles_post_ra>
// kernel: gaussian_policy_forward.1
= control target key start
LH: loop header
LB: loop body
LE: loop exit
PB: predicated region body
PF: predicated region fallthrough
CT: control target
= control target key end

     0   :  { %v315_v1 = vmov 0.0   ;;  %vm45_vm0 = vcmask 130048   ;;  %vm316_vm1 = vmmov 0   ;;  %s397_s0 = inlined_call_operand.vmem [shape: f32[8,16], index: 0, kind: input, shape index: {}]   ;;  %s398_s1 = inlined_call_operand.vmem [shape: bf16[16,32], index: 1, kind: input, shape index: {}]   ;;  %s399_s2 = inlined_call_operand.vmem [shape: f32[1,32], index: 2, kind: input, shape index: {}]   ;;  %s400_s3 = inlined_call_operand.vmem [shape: bf16[32,32], index: 3, kind: input, shape index: {}]   ;;  %s401_s4 = inlined_call_operand.vmem [shape: f32[1,32], index: 4, kind: input, shape index: {}]   ;;  %s402_s5 = inlined_call_operand.vmem [shape: bf16[32,8], index: 5, kind: input, shape index: {}]   ;;  %s403_s6 = inlined_call_operand.vmem [shape: f32[1,8], index: 6, kind: input, shape index: {}]   ;;  %s404_s7 = inlined_call_operand.hbm [shape: f32[8,8], index: 7, kind: output, shape index: {}]  }
   0x1   :  { %v286_v0 = vld [vmem:[%s398_s1] sm:$0xff]   ;;  %261 = vmatprep.subr.bf16.mxu0 %v315_v1  ;;  %267 = vmatprep.subr.bf16.mxu1 %v315_v1 }
   0x2   :  { %v28_v2 = vld [vmem:[%s397_s0] sm:$0xff]  ;;  %262 = vmatpush3.bf16.msra.mxu0 %v286_v0  ;;  %263 = vmatprep.mubr.msk.bf16.mxu0 %vm316_vm1, %v315_v1 }
   0x3   :  { %v29_v3 = vpack.c.bf16 %v28_v2, %v28_v2  ;;  %271 = vmatprep.mubr.msk.bf16.mxu1 %vm316_vm1, %v315_v1  ;;  %275 = vmatprep.subr.bf16.mxu0 %v315_v1 }
   0x4   :  { %12 = vsyncpa [#allocation3], 0  ;;  %v287_v4 = vld [vmem:[%s400_s3] sm:$0xff]   ;;  %v288_v5 = vld [vmem:[%s400_s3 + $0x8] sm:$0xff]   ;;  %vm114_vm2 = vcmask 261120   ;;  %s317_s15 = smov [#allocation2]  }
   0x5   :  { %264 = vmatmul.mubr.msk.bf16.vlgmr.msra.gmra.mrb[0].mxu0 %vm45_vm0, %v29_v3  ;;  %268 = vmatpush3.bf16.msra.mxu1 %v287_v4  ;;  %v289_v6 = vld [vmem:[%s402_s5] sm:$0xff]   ;;  %v290_v15 = vld [vmem:[%s402_s5 + $0x8] sm:$0xff]   ;;  %s234_s16 = sshll.u32 %s317_s15, 4  ;;  %vm226_vm3 = vcmask 64512   ;;  %s235_s16 = int_to_ptr.vmem [resolvable:$true] %s234_s16 }
   0x6   :  { %279 = vmatprep.mubr.msk.bf16.mxu0 %vm316_vm1, %v315_v1  ;;  %269 = vmatprep.subr.bf16.mxu1 %v315_v1  ;;  %v242_v7 = vld [vmem:[%s399_s2] ss:$0 sm:$0xff]  ;;  %p296_p1 = scmp.lt.s32.totalorder %s235_s16, %s235_s16 }
   0x7   :  { %276 = vmatpush3.bf16.msra.mxu0 %v289_v6  ;;  %v245_v16 = vld [vmem:[%s401_s4] ss:$0 sm:$0xff]  ;;  %s291_s4 = scalar_lea.vmem %s235_s16, 128 }
   0x8   :  { %277 = vmatprep.subr.bf16.mxu0 %v315_v1  ;;  %v249_v24 = vld [vmem:[%s403_s6] ss:$0 sm:$0xff]  ;;  %p292_p0 = scmp.ne.s32.totalorder %s235_s16, %s291_s4  ;;  %p297_p2 = scmp.lt.s32.totalorder %s291_s4, %s291_s4 }
   0x9   :  { %270 = vmatpush3.bf16.msra.mxu1 %v288_v5 }
   0xa   :  { %p298_p3 = por %p297_p2, %p296_p1 }
   0xb   :  { %278 = vmatpush3.bf16.msra.mxu0 %v290_v15 }
   0xc   :  { %p299_p4 = pnand %p298_p3, %p292_p0 }
  0xd8   :  { %v83_v8 = vpop.f32.mrb[0].mxu0 }
  0xd9   :  { %v84_v9 = vadd.f32 %v242_v7, %v83_v8  ;;  %v265_v10 = vpop.f32.mrb[1].mxu0 }
  0xda   :  { %v86_v11 = vpop.f32.mrb[2].mxu0 }
  0xdb   :  { %v89_v12 = vmax.f32 %v84_v9, 0.0  ;;  %v266_v13 = vpop.f32.mrb[3].mxu0 }
  0xdd   :  { %v90_v14 = vpack.c.bf16 %v89_v12, %v89_v12 }
  0xdf   :  { %272 = vmatmul.mubr.msk.bf16.vlgmr.msra.gmra.mrb[0].mxu1 %vm114_vm2, %v90_v14 }
 0x1b2   :  { %v152_v17 = vpop.f32.mrb[0].mxu1 }
 0x1b3   :  { %v153_v18 = vadd.f32 %v245_v16, %v152_v17  ;;  %v273_v19 = vpop.f32.mrb[1].mxu1 }
 0x1b4   :  { %v155_v20 = vpop.f32.mrb[2].mxu1 }
 0x1b5   :  { %v158_v21 = vmax.f32 %v153_v18, 0.0  ;;  %v274_v22 = vpop.f32.mrb[3].mxu1 }
 0x1b7   :  { %v159_v23 = vpack.c.bf16 %v158_v21, %v158_v21 }
 0x1b9   :  { %280 = vmatmul.mubr.msk.bf16.vlgmr.msra.gmra.mrb[4].mxu0 %vm114_vm2, %v159_v23 }
 0x28c   :  { %v220_v25 = vpop.f32.mrb[4].mxu0 }
 0x28d   :  { %v221_v26 = vadd.f32 %v249_v24, %v220_v25  ;;  %v281_v27 = vpop.f32.mrb[5].mxu0 }
 0x28e   :  { %v223_v28 = vpop.f32.mrb[6].mxu0 }
 0x28f   :  { %v282_v29 = vpop.f32.mrb[7].mxu0  ;;  %227 = vst.msk [vmem:[#allocation2] sm:$0xff] %vm226_vm3, %v221_v26 }
 0x290   :  { %302 = shalt.err (!%p299_p4)
}
 0x291   :  { %s303_s6 = scalar_lea.hbm %s404_s7, 128 }
 0x292   :  { %p304_p5 = scmp.ne.s32.totalorder %s404_s7, %s303_s6  ;;  %p307_p6 = scmp.lt.u32.totalorder %s303_s6, %s404_s7 }
 0x294   :  { %p309_p7 = pnand %p307_p6, %p304_p5 }
 0x296   :  { %312 = shalt.err (!%p309_p7)
}
 0x297   :  { %237 = dma.vmem_to_hbm [thread:$0]  %s235_s16, 128, %s404_s7, [#allocation3]  }
 0x298   :  { %313 = dma.done.wait [#allocation3], 128  }
 0x299   :  { %314 = vsyncadd [#allocation3], 4294967168 }
 0x29a   :  { %241 = vsyncpa [#allocation3], 1 }

</bundles_post_ra>
